<compile_context>
chip_gen: v5e
topology: v5e:2x2
jax: 0.10.0
libtpu: 0.0.40
codegen_flags: <defaults>
</compile_context>

<pallas_src>
import jax
import jax.numpy as jnp
from jax.experimental import pallas as pl
from jax.experimental.pallas import tpu as pltpu


def _trigger_add_kernel(x_ref, t_ref, y_ref):
    # x_ref/y_ref: (Bt, C*H*W)   lane-dense batch tile
    # t_ref:       (1,  C*H*W)   resident trigger row (sublane-broadcast add on VPU)
    y_ref[...] = x_ref[...] + t_ref[...]


def _pick_batch_tile(B, CHW, dtype_bytes=4):
    """Sublane/lane-dense batch tile: whole array if small, else ~3 MiB slabs."""
    total_bytes = B * CHW * dtype_bytes
    if total_bytes <= (8 << 20):          # small problem: one block, no grid overhead
        return B
    bt = ((3 << 20) // (CHW * dtype_bytes)) // 8 * 8   # ~3 MiB tiles, multiple of 8 rows
    bt = max(8, min(bt, B))
    return bt


def trigger_forward(x_nchw, trigger, eps):
    """x_nchw: [B, C, H, W]; trigger: [C, H, W]; eps: [C, 1, 1].

    Returns (y_nchw, clamped_trigger) matching the PyTorch module's forward output
    and its in-place parameter update (y uses the pre-clamp trigger).
    """
    B, C, H, W = x_nchw.shape
    assert trigger.shape == (C, H, W)
    CHW = C * H * W

    # Lane-dense layouts: channel+spatial collapsed onto the lane axis.
    x2 = x_nchw.reshape(B, CHW)
    t2 = trigger.reshape(1, CHW)

    bt = _pick_batch_tile(B, CHW, x2.dtype.itemsize)
    grid = (pl.cdiv(B, bt),)

    y2 = pl.pallas_call(
        _trigger_add_kernel,
        out_shape=jax.ShapeDtypeStruct((B, CHW), x2.dtype),
        grid_spec=pltpu.PrefetchScalarGridSpec(
            num_scalar_prefetch=0,
            grid=grid,
            in_specs=[
                pl.BlockSpec((bt, CHW), lambda i: (i, 0)),   # x: (Bt, CHW) slab
                pl.BlockSpec((1, CHW), lambda i: (0, 0)),    # trigger: resident row
            ],
            out_specs=pl.BlockSpec((bt, CHW), lambda i: (i, 0)),
        ),
        compiler_params=pltpu.CompilerParams(
            # Batch tiles are independent -> parallel (sharded across TCs on v7x).
            dimension_semantics=("parallel",),
        ),
    )(x2, t2)

    # In-place `trigger.data = clamp(...)` side effect, hoisted out of the kernel
    # (tiny: C*H*W floats) -- plain fused XLA clip.
    trigger_clamped = jnp.clip(trigger, -eps, eps)

    return y2.reshape(B, C, H, W), trigger_clamped


if __name__ == "__main__":
    key = jax.random.PRNGKey(0)
    k_x, k_t = jax.random.split(key)

    B, C, S = 2, 3, 16                      # image_size = 16, RGB channels
    eps_data = 8.0 / 255.0                  # args.eps
    std = jnp.array([0.26862954, 0.26130258, 0.27577711], dtype=jnp.float32)
    eps = (eps_data / std).reshape(3, 1, 1)

    x = jax.random.normal(k_x, (B, C, S, S), dtype=jnp.float32)
    trigger = jax.random.uniform(k_t, (C, S, S), dtype=jnp.float32)  # torch.rand init

    y, trig_clamped = trigger_forward(x, trigger, eps)
    jax.block_until_ready((y, trig_clamped))

    # reference check
    y_ref = x + trigger[None]
    trig_ref = jnp.clip(trigger, -eps, eps)
    assert jnp.allclose(y, y_ref, atol=1e-6)
    assert jnp.allclose(trig_clamped, trig_ref, atol=1e-6)

    print("KERNEL_OK")
</pallas_src>

<mosaic_0001>
module attributes {stable_mosaic.version = 11 : i64} {
  func.func @_trigger_add_kernel(%arg0: i32, %arg1: memref<2x768xf32, #tpu.memory_space<vmem>>, %arg2: memref<1x768xf32, #tpu.memory_space<vmem>>, %arg3: memref<2x768xf32, #tpu.memory_space<vmem>>) attributes {dimension_semantics = [#tpu.dimension_semantics<parallel>], iteration_bounds = array<i64: 1>, scalar_prefetch = 0 : i64, scratch_operands = 0 : i64, tpu.core_type = #tpu.core_type<tc>, window_params = [{transform_indices = @transform_0, window_bounds = array<i64: 2, 768>}, {pipeline_mode = #tpu.pipeline_mode<synchronous>, transform_indices = @transform_1, window_bounds = array<i64: 1, 768>}, {transform_indices = @transform_2, window_bounds = array<i64: 2, 768>}]} {
    %c0 = arith.constant 0 : index
    %c0_0 = arith.constant 0 : index
    %0 = vector.load %arg1[%c0, %c0_0] : memref<2x768xf32, #tpu.memory_space<vmem>>, vector<2x768xf32>
    %c0_1 = arith.constant 0 : index
    %c0_2 = arith.constant 0 : index
    %1 = vector.load %arg2[%c0_1, %c0_2] : memref<1x768xf32, #tpu.memory_space<vmem>>, vector<1x768xf32>
    %2 = vector.broadcast %1 : vector<1x768xf32> to vector<2x768xf32>
    %3 = arith.addf %0, %2 : vector<2x768xf32>
    %c0_3 = arith.constant 0 : index
    %c0_4 = arith.constant 0 : index
    %4 = vector.load %arg3[%c0_3, %c0_4] : memref<2x768xf32, #tpu.memory_space<vmem>>, vector<2x768xf32>
    tpu.vector_store %arg3[%c0_3, %c0_4], %3 {strides = array<i32>} : memref<2x768xf32, #tpu.memory_space<vmem>>, vector<2x768xf32>,
    return
  }
  func.func @transform_0(%arg0: i32) -> (i32, i32) {
    %c0_i32 = arith.constant 0 : i32
    %c0_i32_0 = arith.constant 0 : i32
    return %arg0, %c0_i32 : i32, i32
  }
  func.func @transform_1(%arg0: i32) -> (i32, i32) {
    %c0_i32 = arith.constant 0 : i32
    %c0_i32_0 = arith.constant 0 : i32
    %c0_i32_1 = arith.constant 0 : i32
    return %c0_i32, %c0_i32_0 : i32, i32
  }
  func.func @transform_2(%arg0: i32) -> (i32, i32) {
    %c0_i32 = arith.constant 0 : i32
    %c0_i32_0 = arith.constant 0 : i32
    return %arg0, %c0_i32 : i32, i32
  }
}

</mosaic_0001>

<bundles_post_ra>
// kernel: tpu_custom_call.1
= control target key start
LH: loop header
LB: loop body
LE: loop exit
PB: predicated region body
PF: predicated region fallthrough
CT: control target
= control target key end

     0   :  { %7 = vsyncpa [#allocation3], 0  ;;  %s195_s0 = inlined_call_operand.hbm [shape: f32[2,768], index: 0, kind: input, shape index: {}]   ;;  %s196_s1 = inlined_call_operand.hbm [shape: f32[1,768], index: 1, kind: input, shape index: {}]   ;;  %s197_s2 = inlined_call_operand.hbm [shape: f32[2,768], index: 2, kind: output, shape index: {}]  }
   0x1   :  { %8 = vsyncpa [#allocation6], 0 }
   0x2   :  { %9 = vsyncpa [#allocation4], 0  ;;  %s15_s11 = sshll.u32 %s195_s0, 4  ;;  %s166_s12 = smov [#allocation2]   ;;  %s16_s11 = int_to_ptr.hbm [resolvable:$true] %s15_s11 }
   0x3   :  { %s17_s13 = sshll.u32 %s166_s12, 4  ;;  %s26_s16 = sshll.u32 %s196_s1, 4  ;;  %s18_s13 = int_to_ptr.vmem [resolvable:$true] %s17_s13  ;;  %s27_s16 = int_to_ptr.hbm [resolvable:$true] %s26_s16 }
   0x4   :  { %20 = dma.hbm_to_vmem [thread:$0]  %s16_s11, 192, %s18_s13, [#allocation3]  }
   0x5   :  { %s167_s17 = smov [#allocation5]  }
   0x6   :  { %s28_s18 = sshll.u32 %s167_s17, 4  ;;  %s29_s18 = int_to_ptr.vmem [resolvable:$true] %s28_s18 }
   0x7   :  { %31 = dma.hbm_to_vmem [thread:$0]  %s27_s16, 96, %s29_s18, [#allocation6]  }
   0x8   :  { %160 = dma.done.wait [#allocation3], 192  }
   0x9   :  { %161 = vsyncadd [#allocation3], 4294967104 }
   0xa   :  { %162 = dma.done.wait [#allocation6], 96  }
   0xb   :  { %163 = vsyncadd [#allocation6], 4294967200  ;;  %v42_v0 = vld [vmem:[#allocation5] sm:$0x3f]  ;;  %vm54_vm0 = vcmask 1041408   ;;  %vm56_vm1 = vcmask 1045508  }
   0xc   :  { %v44_v1 = vperm.slane %v42_v0, 0  ;;  %v45_v2 = vperm.slane %v42_v0, 1  ;;  %v46_v3 = vperm.slane %v42_v0, 2  ;;  %v47_v4 = vperm.slane %v42_v0, 3  ;;  %v40_v10 = vld [vmem:[#allocation2] sm:$0xff]  ;;  %s168_s0 = smov [#allocation7]  }
   0xd   :  { %v48_v5 = vperm.slane %v42_v0, 4  ;;  %v49_v6 = vperm.slane %v42_v0, 5  ;;  %vm58_vm2 = vcmask 1043456   ;;  %v41_v11 = vld [vmem:[#allocation2 + $0x8] sm:$0xf]  ;;  %s72_s1 = sshll.u32 %s168_s0, 4  ;;  %s73_s1 = int_to_ptr.vmem [resolvable:$true] %s72_s1 }
   0xe   :  { %v50_v7 = vrot.slane %v45_v2, 6  ;;  %v51_v8 = vrot.slane %v46_v3, 4  ;;  %v52_v9 = vrot.slane %v47_v4, 2  ;;  %s74_s21 = sshll.u32 %s197_s2, 4  ;;  %s75_s21 = int_to_ptr.hbm [resolvable:$true] %s74_s21 }
   0xf   :  { %v53_v12 = vrot.slane %v49_v6, 6 }
  0x10   :  { %v55_v13 = vsel %vm54_vm0, %v44_v1, %v50_v7  ;;  %v57_v14 = vsel %vm56_vm1, %v51_v8, %v52_v9 }
  0x11   :  { %v59_v15 = vsel %vm58_vm2, %v55_v13, %v57_v14  ;;  %v60_v16 = vsel %vm54_vm0, %v48_v5, %v53_v12 }
  0x12   :  { %v63_v17 = vadd.f32 %v59_v15, %v40_v10  ;;  %v64_v18 = vadd.f32 %v60_v16, %v41_v11 }
  0x14   :  { %65 = vst [vmem:[#allocation7] sm:$0xff] %v63_v17 }
  0x15   :  { %66 = vst [vmem:[#allocation7 + $0x8] sm:$0xf] %v64_v18 }
  0x16   :  { %77 = dma.vmem_to_hbm [thread:$0]  %s73_s1, 192, %s75_s21, [#allocation4]  }
  0x17   :  { %164 = dma.done.wait [#allocation4], 192  }
  0x18   :  { %165 = vsyncadd [#allocation4], 4294967104 }
  0x19   :  { %82 = vsyncpa [#allocation3], 1 }
  0x1a   :  { %83 = vsyncpa [#allocation6], 1 }
  0x1b   :  { %84 = vsyncpa [#allocation4], 1 }

</bundles_post_ra>
